<compile_context>
chip_gen: v6e
topology: v6e:2x2x1
jax: 0.10.0
libtpu: 0.0.40
codegen_flags: <defaults>
</compile_context>

<pallas_src>
import functools

import jax
import jax.numpy as jnp
from jax.experimental import pallas as pl
from jax.experimental.pallas import tpu as pltpu


def _round_up(x, m):
    return ((x + m - 1) // m) * m


def _tiling(n):
    """Padded node count and (row, reduction) tile sizes for the A stream."""
    if n <= 256:
        tile = 128
    elif n <= 2048:
        tile = 256
    else:
        tile = 512  # 512x512 bf16 A tile = 512 KiB per buffer: fits v5e/v6e/v7x
    n_pad = _round_up(n, tile)
    return n_pad, tile, tile


def gcn_layer_kernel(a_ref, dinv_ref, r_ref, w_ref, b_ref, o_ref, acc_ref,
                     *, tm, tk, apply_relu):
    """out[i] = act( dinv_i * (sum_k A[i,k] @ (dinv_k * R[k])) @ W + b )."""
    i = pl.program_id(0)
    k = pl.program_id(1)

    @pl.when(k == 0)
    def _():
        acc_ref[...] = jnp.zeros_like(acc_ref)

    # Column side of D^-1/2 (A+I) D^-1/2 folded onto the VMEM-resident operand.
    kk = pl.multiple_of(k * tk, tk)
    r_blk = dinv_ref[pl.ds(kk, tk), :] * r_ref[pl.ds(kk, tk), :]
    acc_ref[...] += jnp.dot(a_ref[...], r_blk.astype(jnp.bfloat16),
                            preferred_element_type=jnp.float32)

    @pl.when(k == pl.num_programs(1) - 1)
    def _():
        ii = pl.multiple_of(i * tm, tm)
        h = dinv_ref[pl.ds(ii, tm), :] * acc_ref[...]     # row side of D^-1/2
        o = jnp.dot(h, w_ref[...], preferred_element_type=jnp.float32) + b_ref[...]
        if apply_relu:
            o = jnp.maximum(o, 0.0)
        o_ref[...] = o.astype(o_ref.dtype)


def _gcn_layer(a_bf16, dinv, r, w, b, *, apply_relu, tm, tk):
    n_pad = a_bf16.shape[0]
    fr = r.shape[1]
    fo = w.shape[1]
    grid = (n_pad // tm, n_pad // tk)

    flops = 2 * n_pad * n_pad * fr + 2 * n_pad * fr * fo
    bytes_accessed = (n_pad * n_pad * 2                      # streamed bf16 A
                      + n_pad * fr * 4 + fr * fo * 4 + fo * 4 + n_pad * 4
                      + n_pad * fo * 4)                      # output

    kernel = functools.partial(gcn_layer_kernel, tm=tm, tk=tk,
                               apply_relu=apply_relu)

    return pl.pallas_call(
        kernel,
        out_shape=jax.ShapeDtypeStruct((n_pad, fo), jnp.float32),
        grid_spec=pltpu.PrefetchScalarGridSpec(
            num_scalar_prefetch=0,
            grid=grid,
            in_specs=[
                pl.BlockSpec((tm, tk), lambda i, k: (i, k)),       # A tile (streamed)
                pl.BlockSpec((n_pad, 1), lambda i, k: (0, 0)),     # dinv   (resident)
                pl.BlockSpec((n_pad, fr), lambda i, k: (0, 0)),    # R      (resident)
                pl.BlockSpec((fr, fo), lambda i, k: (0, 0)),       # W      (resident)
                pl.BlockSpec((1, fo), lambda i, k: (0, 0)),        # bias   (resident)
            ],
            out_specs=pl.BlockSpec((tm, fo), lambda i, k: (i, 0)),
            scratch_shapes=[pltpu.VMEM((tm, fr), jnp.float32)],
        ),
        compiler_params=pltpu.CompilerParams(
            dimension_semantics=("parallel", "arbitrary"),
            vmem_limit_bytes=32 * 1024 * 1024,
        ),
        cost_estimate=pl.CostEstimate(flops=flops, transcendentals=0,
                                      bytes_accessed=bytes_accessed),
    )(a_bf16, dinv, r, w, b)


def gnn_encoder_forward(x, edge_index, degree_set, params, degree_set_size):
    """Matches GNNEncoder.forward(x, edge_index, degree_set) (2x PyG GCNConv)."""
    w1, b1, w2, b2 = params
    N, in_ch = x.shape
    f_in = in_ch + degree_set_size
    hidden = w1.shape[1]
    out_ch = w2.shape[1]

    # ---- plain-JAX glue: one-hot degree features + concat (as in the module) ----
    one_hot = jax.nn.one_hot(degree_set.astype(jnp.int32), degree_set_size,
                             dtype=jnp.float32)
    x_cat = jnp.concatenate([x.astype(jnp.float32), one_hot], axis=1)  # [N, f_in]

    # ---- raw adjacency with self loops, built already padded; A_hat is NOT
    #      materialized (normalization folded into the kernel) ----
    n_pad, tm, tk = _tiling(N)
    src, dst = edge_index[0], edge_index[1]
    diag = jnp.arange(N, dtype=jnp.int32)
    A = (jnp.zeros((n_pad, n_pad), jnp.float32)
         .at[dst, src].add(1.0)            # messages flow src -> dst (PyG GCNConv)
         .at[diag, diag].add(1.0))         # add_self_loops=True
    deg = A.sum(axis=1)
    dinv = jnp.where(deg > 0, jax.lax.rsqrt(deg), 0.0).reshape(n_pad, 1)
    a_bf16 = A.astype(jnp.bfloat16)        # small integer counts: exact in bf16
    # TODO(synk): for large sparse graphs replace this dense O(N^2) adjacency
    # stream with a CSR / scalar-prefetch gather kernel (PrefetchScalarGridSpec).

    # ---- zero-pad feature dims to multiples of 128 (lane-dense, exact math) ----
    f_pad = _round_up(f_in, 128)
    h_pad = _round_up(hidden, 128)
    o_pad = _round_up(out_ch, 128)

    x_p = jnp.pad(x_cat, ((0, n_pad - N), (0, f_pad - f_in)))
    w1_p = jnp.pad(w1.astype(jnp.float32), ((0, f_pad - f_in), (0, h_pad - hidden)))
    b1_p = jnp.pad(b1.astype(jnp.float32), (0, h_pad - hidden)).reshape(1, -1)
    w2_p = jnp.pad(w2.astype(jnp.float32), ((0, h_pad - hidden), (0, o_pad - out_ch)))
    b2_p = jnp.pad(b2.astype(jnp.float32), (0, o_pad - out_ch)).reshape(1, -1)

    # ---- two tiled GCN layers on the TPU ----
    h = _gcn_layer(a_bf16, dinv, x_p, w1_p, b1_p, apply_relu=True, tm=tm, tk=tk)
    out_p = _gcn_layer(a_bf16, dinv, h, w2_p, b2_p, apply_relu=False, tm=tm, tk=tk)

    return out_p[:N, :out_ch].astype(x.dtype)


if __name__ == "__main__":
    key = jax.random.PRNGKey(0)

    # Small shapes consistent with the module's forward.
    N = 16
    in_channels = 4
    degree_set_size = 8
    out_channels = 16
    hidden = 2 * out_channels
    f_in = in_channels + degree_set_size

    k_x, k_deg, k_w1, k_w2 = jax.random.split(key, 4)

    x = jax.random.normal(k_x, (N, in_channels), dtype=jnp.float32)

    # Small undirected ring graph (both edge directions present).
    ring_src = jnp.arange(N, dtype=jnp.int32)
    ring_dst = (ring_src + 1) % N
    edge_index = jnp.stack(
        [jnp.concatenate([ring_src, ring_dst]),
         jnp.concatenate([ring_dst, ring_src])], axis=0)            # [2, 2N]

    degree_set = jax.random.randint(k_deg, (N,), 0, degree_set_size)

    # Deterministic (glorot-ish) init; biases start at zero like PyG.
    w1 = jax.random.normal(k_w1, (f_in, hidden), jnp.float32) / jnp.sqrt(
        jnp.float32(f_in))
    b1 = jnp.zeros((hidden,), jnp.float32)
    w2 = jax.random.normal(k_w2, (hidden, out_channels), jnp.float32) / jnp.sqrt(
        jnp.float32(hidden))
    b2 = jnp.zeros((out_channels,), jnp.float32)

    params = (w1, b1, w2, b2)
    out = gnn_encoder_forward(x, edge_index, degree_set, params, degree_set_size)
    jax.block_until_ready(out)
    assert out.shape == (N, out_channels)

    # Pure-JAX f32 reference to sanity-check the bf16-MXU kernel path.
    oh = jax.nn.one_hot(degree_set.astype(jnp.int32), degree_set_size,
                        dtype=jnp.float32)
    xc = jnp.concatenate([x, oh], axis=1)
    A_ref = jnp.zeros((N, N), jnp.float32).at[edge_index[1], edge_index[0]].add(1.0)
    A_ref = A_ref + jnp.eye(N, dtype=jnp.float32)
    deg_r = A_ref.sum(axis=1)
    dinv_r = jnp.where(deg_r > 0, 1.0 / jnp.sqrt(deg_r), 0.0)
    A_hat = dinv_r[:, None] * A_ref * dinv_r[None, :]
    h_ref = jnp.maximum(A_hat @ xc @ w1 + b1, 0.0)
    ref = A_hat @ h_ref @ w2 + b2
    err = jnp.max(jnp.abs(out - ref))
    assert bool(jnp.isfinite(err)) and float(err) < 1e-1, f"max |err| = {err}"

    print("KERNEL_OK")
</pallas_src>

<mosaic_0001>
module attributes {stable_mosaic.version = 11 : i64} {
  func.func @gcn_layer_kernel(%arg0: i32, %arg1: i32, %arg2: memref<128x128xbf16, #tpu.memory_space<vmem>>, %arg3: memref<128x1xf32, #tpu.memory_space<vmem>>, %arg4: memref<128x128xf32, #tpu.memory_space<vmem>>, %arg5: memref<128x128xf32, #tpu.memory_space<vmem>>, %arg6: memref<1x128xf32, #tpu.memory_space<vmem>>, %arg7: memref<128x128xf32, #tpu.memory_space<vmem>>, %arg8: memref<128x128xf32, #tpu.memory_space<vmem>>) attributes {dimension_semantics = [#tpu.dimension_semantics<parallel>, #tpu.dimension_semantics<arbitrary>], iteration_bounds = array<i64: 1, 1>, scalar_prefetch = 0 : i64, scratch_operands = 1 : i64, tpu.core_type = #tpu.core_type<tc>, window_params = [{transform_indices = @transform_0, window_bounds = array<i64: 128, 128>}, {pipeline_mode = #tpu.pipeline_mode<synchronous>, transform_indices = @transform_1, window_bounds = array<i64: 128, 1>}, {pipeline_mode = #tpu.pipeline_mode<synchronous>, transform_indices = @transform_2, window_bounds = array<i64: 128, 128>}, {pipeline_mode = #tpu.pipeline_mode<synchronous>, transform_indices = @transform_3, window_bounds = array<i64: 128, 128>}, {pipeline_mode = #tpu.pipeline_mode<synchronous>, transform_indices = @transform_4, window_bounds = array<i64: 1, 128>}, {transform_indices = @transform_5, window_bounds = array<i64: 128, 128>}]} {
    %c0_i32 = arith.constant 0 : i32
    %0 = arith.cmpi eq, %arg1, %c0_i32 : i32
    %1 = arith.extui %0 : i1 to i32
    %c0_i32_0 = arith.constant 0 : i32
    %2 = arith.cmpi ne, %1, %c0_i32_0 : i32
    scf.if %2 {
      %cst_10 = arith.constant 0.000000e+00 : f32
      %20 = vector.broadcast %cst_10 : f32 to vector<128x128xf32>
      %c0_11 = arith.constant 0 : index
      %c0_12 = arith.constant 0 : index
      %21 = vector.load %arg8[%c0_11, %c0_12] : memref<128x128xf32, #tpu.memory_space<vmem>>, vector<128x128xf32>
      tpu.vector_store %arg8[%c0_11, %c0_12], %20 {strides = array<i32>} : memref<128x128xf32, #tpu.memory_space<vmem>>, vector<128x128xf32>,
    } else {
    }
    %c128_i32 = arith.constant 128 : i32
    %3 = arith.muli %arg1, %c128_i32 : i32
    %4 = tpu.assume_multiple %3, 128 : i32
    %5 = arith.index_cast %4 : i32 to index
    %c0 = arith.constant 0 : index
    %6 = vector.load %arg3[%5, %c0] : memref<128x1xf32, #tpu.memory_space<vmem>>, vector<128x1xf32>
    %7 = arith.index_cast %4 : i32 to index
    %c0_1 = arith.constant 0 : index
    %8 = vector.load %arg4[%7, %c0_1] : memref<128x128xf32, #tpu.memory_space<vmem>>, vector<128x128xf32>
    %9 = vector.broadcast %6 : vector<128x1xf32> to vector<128x128xf32>
    %10 = arith.mulf %9, %8 : vector<128x128xf32>
    %c0_2 = arith.constant 0 : index
    %c0_3 = arith.constant 0 : index
    %11 = vector.load %arg8[%c0_2, %c0_3] : memref<128x128xf32, #tpu.memory_space<vmem>>, vector<128x128xf32>
    %c0_4 = arith.constant 0 : index
    %c0_5 = arith.constant 0 : index
    %12 = vector.load %arg2[%c0_4, %c0_5] : memref<128x128xbf16, #tpu.memory_space<vmem>>, vector<128x128xbf16>
    %13 = arith.truncf %10 : vector<128x128xf32> to vector<128x128xbf16>
    %cst = arith.constant dense<0.000000e+00> : vector<128x128xf32>
    %14 = tpu.matmul %12, %13, %cst {dimension_numbers = #tpu.dot_dimension_numbers<[1], [0], [0], [1], [0, 0, 1, 1], [], []>} : vector<128x128xbf16>, vector<128x128xbf16>, vector<128x128xf32> -> vector<128x128xf32>
    %15 = arith.addf %11, %14 : vector<128x128xf32>
    %c0_6 = arith.constant 0 : index
    %c0_7 = arith.constant 0 : index
    %16 = vector.load %arg8[%c0_6, %c0_7] : memref<128x128xf32, #tpu.memory_space<vmem>>, vector<128x128xf32>
    tpu.vector_store %arg8[%c0_6, %c0_7], %15 {strides = array<i32>} : memref<128x128xf32, #tpu.memory_space<vmem>>, vector<128x128xf32>,
    %c0_i32_8 = arith.constant 0 : i32
    %17 = arith.cmpi eq, %arg1, %c0_i32_8 : i32
    %18 = arith.extui %17 : i1 to i32
    %c0_i32_9 = arith.constant 0 : i32
    %19 = arith.cmpi ne, %18, %c0_i32_9 : i32
    scf.if %19 {
      %c128_i32_10 = arith.constant 128 : i32
      %20 = arith.muli %arg0, %c128_i32_10 : i32
      %21 = tpu.assume_multiple %20, 128 : i32
      %22 = arith.index_cast %21 : i32 to index
      %c0_11 = arith.constant 0 : index
      %23 = vector.load %arg3[%22, %c0_11] : memref<128x1xf32, #tpu.memory_space<vmem>>, vector<128x1xf32>
      %c0_12 = arith.constant 0 : index
      %c0_13 = arith.constant 0 : index
      %24 = vector.load %arg8[%c0_12, %c0_13] : memref<128x128xf32, #tpu.memory_space<vmem>>, vector<128x128xf32>
      %25 = vector.broadcast %23 : vector<128x1xf32> to vector<128x128xf32>
      %26 = arith.mulf %25, %24 : vector<128x128xf32>
      %c0_14 = arith.constant 0 : index
      %c0_15 = arith.constant 0 : index
      %27 = vector.load %arg5[%c0_14, %c0_15] : memref<128x128xf32, #tpu.memory_space<vmem>>, vector<128x128xf32>
      %cst_16 = arith.constant dense<0.000000e+00> : vector<128x128xf32>
      %28 = tpu.matmul %26, %27, %cst_16 {dimension_numbers = #tpu.dot_dimension_numbers<[1], [0], [0], [1], [0, 0, 1, 1], [], []>} : vector<128x128xf32>, vector<128x128xf32>, vector<128x128xf32> -> vector<128x128xf32>
      %c0_17 = arith.constant 0 : index
      %c0_18 = arith.constant 0 : index
      %29 = vector.load %arg6[%c0_17, %c0_18] : memref<1x128xf32, #tpu.memory_space<vmem>>, vector<1x128xf32>
      %30 = vector.broadcast %29 : vector<1x128xf32> to vector<128x128xf32>
      %31 = arith.addf %28, %30 : vector<128x128xf32>
      %cst_19 = arith.constant 0.000000e+00 : f32
      %32 = vector.broadcast %cst_19 : f32 to vector<128x128xf32>
      %33 = arith.maximumf %31, %32 : vector<128x128xf32>
      %c0_20 = arith.constant 0 : index
      %c0_21 = arith.constant 0 : index
      %34 = vector.load %arg7[%c0_20, %c0_21] : memref<128x128xf32, #tpu.memory_space<vmem>>, vector<128x128xf32>
      tpu.vector_store %arg7[%c0_20, %c0_21], %33 {strides = array<i32>} : memref<128x128xf32, #tpu.memory_space<vmem>>, vector<128x128xf32>,
    } else {
    }
    return
  }
  func.func @transform_0(%arg0: i32, %arg1: i32) -> (i32, i32) {
    %c0_i32 = arith.constant 0 : i32
    return %arg0, %arg1 : i32, i32
  }
  func.func @transform_1(%arg0: i32, %arg1: i32) -> (i32, i32) {
    %c0_i32 = arith.constant 0 : i32
    %c0_i32_0 = arith.constant 0 : i32
    %c0_i32_1 = arith.constant 0 : i32
    return %c0_i32, %c0_i32_0 : i32, i32
  }
  func.func @transform_2(%arg0: i32, %arg1: i32) -> (i32, i32) {
    %c0_i32 = arith.constant 0 : i32
    %c0_i32_0 = arith.constant 0 : i32
    %c0_i32_1 = arith.constant 0 : i32
    return %c0_i32, %c0_i32_0 : i32, i32
  }
  func.func @transform_3(%arg0: i32, %arg1: i32) -> (i32, i32) {
    %c0_i32 = arith.constant 0 : i32
    %c0_i32_0 = arith.constant 0 : i32
    %c0_i32_1 = arith.constant 0 : i32
    return %c0_i32, %c0_i32_0 : i32, i32
  }
  func.func @transform_4(%arg0: i32, %arg1: i32) -> (i32, i32) {
    %c0_i32 = arith.constant 0 : i32
    %c0_i32_0 = arith.constant 0 : i32
    %c0_i32_1 = arith.constant 0 : i32
    return %c0_i32, %c0_i32_0 : i32, i32
  }
  func.func @transform_5(%arg0: i32, %arg1: i32) -> (i32, i32) {
    %c0_i32 = arith.constant 0 : i32
    %c0_i32_0 = arith.constant 0 : i32
    return %arg0, %c0_i32 : i32, i32
  }
}

</mosaic_0001>

<bundles_post_ra>
// kernel: tpu_custom_call.1
= control target key start
LH: loop header
LB: loop body
LE: loop exit
PB: predicated region body
PF: predicated region fallthrough
CT: control target
= control target key end

     0   :  { %10 = vsyncpa [#allocation4], 0  ;;  %s1168_s0 = inlined_call_operand.hbm [shape: bf16[128,128], index: 0, kind: input, shape index: {}]   ;;  %s1169_s1 = inlined_call_operand.vmem [shape: f32[128,1], index: 1, kind: input, shape index: {}]   ;;  %s1170_s2 = inlined_call_operand.vmem [shape: f32[128,128], index: 2, kind: input, shape index: {}]   ;;  %s1171_s3 = inlined_call_operand.hbm [shape: f32[128,128], index: 3, kind: input, shape index: {}]   ;;  %s1172_s4 = inlined_call_operand.vmem [shape: f32[1,128], index: 4, kind: input, shape index: {}]   ;;  %s1173_s5 = inlined_call_operand.hbm [shape: f32[128,128], index: 5, kind: output, shape index: {}]  }
   0x1   :  { %11 = vsyncpa [#allocation7], 0 }
   0x2   :  { %12 = vsyncpa [#allocation5], 0  ;;  %s998_s18 = smov [#allocation3]  }
   0x3   :  { %s18_s19 = sshll.u32 %s998_s18, 4  ;;  %s19_s19 = int_to_ptr.vmem [resolvable:$true] %s18_s19 }
   0x4   :  { %s940_s20 = scalar_lea.vmem %s19_s19, 1024  ;;  %p945_p1 = scmp.lt.s32.totalorder %s19_s19, %s19_s19 }
   0x5   :  { %p941_p0 = scmp.ne.s32.totalorder %s19_s19, %s940_s20  ;;  %p946_p2 = scmp.lt.s32.totalorder %s940_s20, %s940_s20 }
   0x7   :  { %p947_p3 = por %p946_p2, %p945_p1 }
   0x9   :  { %p948_p4 = pnand %p947_p3, %p941_p0 }
   0xb   :  { %951 = shalt.err (!%p948_p4)
}
   0xc   :  { %s999_s21 = smov 64   ;;  %s1000_s22 = smov 4  }
   0xd   :  { %24 = dma.hbm_to_vmem [thread:$0]  %s1168_s0, 1024, %s19_s19, [#allocation4], %s999_s21, %s999_s21, %s1000_s22  }
   0xe   :  { %s1001_s25 = smov [#allocation6]  }
   0xf   :  { %s34_s26 = sshll.u32 %s1001_s25, 4  ;;  %s35_s26 = int_to_ptr.vmem [resolvable:$true] %s34_s26 }
  0x10   :  { %s960_s27 = scalar_lea.vmem %s35_s26, 2048  ;;  %p965_p6 = scmp.lt.s32.totalorder %s35_s26, %s35_s26 }
  0x11   :  { %p961_p5 = scmp.ne.s32.totalorder %s35_s26, %s960_s27  ;;  %p966_p7 = scmp.lt.s32.totalorder %s960_s27, %s960_s27 }
  0x13   :  { %p967_p8 = por %p966_p7, %p965_p6 }
  0x15   :  { %p968_p9 = pnand %p967_p8, %p961_p5 }
  0x17   :  { %971 = shalt.err (!%p968_p9)
}
  0x18   :  { %s1002_s28 = smov 128   ;;  %s1003_s29 = smov 8  }
  0x19   :  { %40 = dma.hbm_to_vmem [thread:$0]  %s1171_s3, 2048, %s35_s26, [#allocation7], %s1002_s28, %s1002_s28, %s1003_s29  }
  0x1a   :  { %992 = dma.done.wait [#allocation4], 1024  }
  0x1b   :  { %993 = vsyncadd [#allocation4], 4294966272 }
  0x1c   :  { %994 = dma.done.wait [#allocation7], 2048  }
  0x1d   :  { %995 = vsyncadd [#allocation7], 4294965248  ;;  %v1004_v0 = vmov 0   ;;  %v86_v1 = vld [vmem:[%s1169_s1 + $0x70] sm:$0xff]  ;;  %v84_v2 = vld [vmem:[%s1169_s1 + $0x60] sm:$0xff] }
  0x1e   :  { %923 = vset.pattern.permute.xlu1 %v1004_v0  ;;  %922 = vset.pattern.permute.xlu0 %v1004_v0  ;;  %v87_v3 = vld [vmem:[%s1169_s1 + $0x78] sm:$0xff]  ;;  %v85_v4 = vld [vmem:[%s1169_s1 + $0x68] sm:$0xff]  ;;  %v82_v6 = vld [vmem:[%s1169_s1 + $0x50] sm:$0xff] }
  0x1f   :  { %177 = vperm.xlu0 %922, %v86_v1   ;;  %167 = vperm.xlu1 %923, %v84_v2   ;;  %v83_v5 = vld [vmem:[%s1169_s1 + $0x58] sm:$0xff]  ;;  %v81_v7 = vld [vmem:[%s1169_s1 + $0x48] sm:$0xff]  ;;  %v80_v8 = vld [vmem:[%s1169_s1 + $0x40] sm:$0xff] }
  0x20   :  { %v79_v9 = vld [vmem:[%s1169_s1 + $0x38] sm:$0xff]  ;;  %v78_v10 = vld [vmem:[%s1169_s1 + $0x30] sm:$0xff]  ;;  %v77_v11 = vld [vmem:[%s1169_s1 + $0x28] sm:$0xff] }
  0x21   :  { %v76_v12 = vld [vmem:[%s1169_s1 + $0x20] sm:$0xff]  ;;  %v75_v13 = vld [vmem:[%s1169_s1 + $0x18] sm:$0xff]  ;;  %v74_v14 = vld [vmem:[%s1169_s1 + $0x10] sm:$0xff] }
  0x22   :  { %v73_v15 = vld [vmem:[%s1169_s1 + $0x8] sm:$0xff]  ;;  %v72_v16 = vld [vmem:[%s1169_s1] sm:$0xff]  ;;  %v566_v18 = vld [vmem:[#allocation6 + $0x78] sm:$0xff] }
  0x23   :  { %182 = vperm.xlu0 %922, %v87_v3   ;;  %172 = vperm.xlu1 %923, %v85_v4   ;;  %v924_v17 = vld [vmem:[#allocation3] sm:$0xff]   ;;  %v565_v19 = vld [vmem:[#allocation6 + $0x70] sm:$0xff]  ;;  %v564_v20 = vld [vmem:[#allocation6 + $0x68] sm:$0xff] }
  0x24   :  { %842 = vmatprep.mubr.bf16.mxu0 %v924_v17  ;;  %858 = vmatprep.subr.mxu1 %v566_v18  ;;  %v563_v21 = vld [vmem:[#allocation6 + $0x60] sm:$0xff]  ;;  %v562_v22 = vld [vmem:[#allocation6 + $0x58] sm:$0xff]  ;;  %v561_v23 = vld [vmem:[#allocation6 + $0x50] sm:$0xff] }
  0x25   :  { %859 = vmatpush3.msra.mxu1 %v566_v18  ;;  %v560_v24 = vld [vmem:[#allocation6 + $0x48] sm:$0xff]  ;;  %v559_v25 = vld [vmem:[#allocation6 + $0x40] sm:$0xff]  ;;  %v558_v26 = vld [vmem:[#allocation6 + $0x38] sm:$0xff] }
  0x26   :  { %860 = vmatprep.subr.mxu1 %v565_v19  ;;  %v557_v27 = vld [vmem:[#allocation6 + $0x30] sm:$0xff]  ;;  %v556_v28 = vld [vmem:[#allocation6 + $0x28] sm:$0xff]  ;;  %v555_v29 = vld [vmem:[#allocation6 + $0x20] sm:$0xff] }
  0x27   :  { %162 = vperm.xlu1 %923, %v83_v5   ;;  %157 = vperm.xlu0 %922, %v82_v6   ;;  %v103_v32 = vld [vmem:[%s1170_s2 + $0x70] sm:$0xff]  ;;  %v101_v33 = vld [vmem:[%s1170_s2 + $0x60] sm:$0xff]  ;;  %v104_v34 = vld [vmem:[%s1170_s2 + $0x78] sm:$0xff] }
  0x28   :  { %861 = vmatpush3.msra.mxu1 %v565_v19  ;;  %v102_v35 = vld [vmem:[%s1170_s2 + $0x68] sm:$0xff]  ;;  %v100_v42 = vld [vmem:[%s1170_s2 + $0x58] sm:$0xff]  ;;  %v99_v43 = vld [vmem:[%s1170_s2 + $0x50] sm:$0xff] }
  0x29   :  { %862 = vmatprep.subr.mxu1 %v564_v20  ;;  %v98_v50 = vld [vmem:[%s1170_s2 + $0x48] sm:$0xff]  ;;  %v97_v51 = vld [vmem:[%s1170_s2 + $0x40] sm:$0xff]  ;;  %v96_v57 = vld [vmem:[%s1170_s2 + $0x38] sm:$0xff] }
  0x2a   :  { %863 = vmatpush3.msra.mxu1 %v564_v20  ;;  %v95_v58 = vld [vmem:[%s1170_s2 + $0x30] sm:$0xff]  ;;  %v94_v0 = vld [vmem:[%s1170_s2 + $0x28] sm:$0xff] }
  0x2b   :  { %152 = vperm.xlu1 %923, %v81_v7   ;;  %147 = vperm.xlu0 %922, %v80_v8  }
  0x2c   :  { %864 = vmatprep.subr.mxu1 %v563_v21 }
  0x2d   :  { %865 = vmatpush3.msra.mxu1 %v563_v21 }
  0x2e   :  { %866 = vmatprep.subr.mxu1 %v562_v22 }
  0x2f   :  { %142 = vperm.xlu1 %923, %v79_v9   ;;  %137 = vperm.xlu0 %922, %v78_v10  }
  0x30   :  { %867 = vmatpush3.msra.mxu1 %v562_v22  ;;  %v925_v22 = vld [vmem:[#allocation3 + $0x8] sm:$0xff]  }
  0x31   :  { %868 = vmatprep.subr.mxu1 %v561_v23 }
  0x32   :  { %869 = vmatpush3.msra.mxu1 %v561_v23  ;;  %v926_v23 = vld [vmem:[#allocation3 + $0x10] sm:$0xff]  }
  0x33   :  { %132 = vperm.xlu1 %923, %v77_v11   ;;  %127 = vperm.xlu0 %922, %v76_v12  }
  0x34   :  { %870 = vmatprep.subr.mxu1 %v560_v24 }
  0x35   :  { %871 = vmatpush3.msra.mxu1 %v560_v24  ;;  %v927_v24 = vld [vmem:[#allocation3 + $0x18] sm:$0xff]  }
  0x36   :  { %872 = vmatprep.subr.mxu1 %v559_v25 }
  0x37   :  { %122 = vperm.xlu1 %923, %v75_v13   ;;  %117 = vperm.xlu0 %922, %v74_v14  }
  0x38   :  { %873 = vmatpush3.msra.mxu1 %v559_v25  ;;  %v928_v25 = vld [vmem:[#allocation3 + $0x20] sm:$0xff]  }
  0x39   :  { %874 = vmatprep.subr.mxu1 %v558_v26 }
  0x3a   :  { %875 = vmatpush3.msra.mxu1 %v558_v26  ;;  %v929_v26 = vld [vmem:[#allocation3 + $0x28] sm:$0xff]  }
  0x3b   :  { %112 = vperm.xlu1 %923, %v73_v15   ;;  %107 = vperm.xlu0 %922, %v72_v16  }
  0x3c   :  { %876 = vmatprep.subr.mxu1 %v557_v27 }
  0x3d   :  { %877 = vmatpush3.msra.mxu1 %v557_v27  ;;  %v930_v27 = vld [vmem:[#allocation3 + $0x30] sm:$0xff]  }
  0x3e   :  { %878 = vmatprep.subr.mxu1 %v556_v28 }
  0x3f   :  { %462 = vperm.xlu1 %923, %v73_v15   ;;  %457 = vperm.xlu0 %922, %v72_v16   ;;  %v89_v15 = vld [vmem:[%s1170_s2] sm:$0xff] }
  0x40   :  { %879 = vmatpush3.msra.mxu1 %v556_v28  ;;  %v931_v28 = vld [vmem:[#allocation3 + $0x38] sm:$0xff]  }
  0x41   :  { %880 = vmatprep.subr.mxu1 %v555_v29 }
  0x42   :  { %881 = vmatpush3.msra.mxu1 %v555_v29  ;;  %v554_v29 = vld [vmem:[#allocation6 + $0x18] sm:$0xff] }
  0x43   :  { %472 = vperm.xlu1 %923, %v75_v13   ;;  %467 = vperm.xlu0 %922, %v74_v14   ;;  %v90_v14 = vld [vmem:[%s1170_s2 + $0x8] sm:$0xff] }
  0x44   :  { %882 = vmatprep.subr.mxu1 %v554_v29 }
  0x45   :  { %883 = vmatpush3.msra.mxu1 %v554_v29 }
  0x47   :  { %482 = vperm.xlu1 %923, %v77_v11   ;;  %477 = vperm.xlu0 %922, %v76_v12  }
  0x4b   :  { %492 = vperm.xlu1 %923, %v79_v9   ;;  %487 = vperm.xlu0 %922, %v78_v10  }
  0x4f   :  { %502 = vperm.xlu1 %923, %v81_v7   ;;  %497 = vperm.xlu0 %922, %v80_v8   ;;  %v92_v7 = vld [vmem:[%s1170_s2 + $0x18] sm:$0xff]  ;;  %v91_v8 = vld [vmem:[%s1170_s2 + $0x10] sm:$0xff] }
  0x53   :  { %512 = vperm.xlu1 %923, %v83_v5   ;;  %507 = vperm.xlu0 %922, %v82_v6  }
  0x57   :  { %522 = vperm.xlu1 %923, %v85_v4   ;;  %517 = vperm.xlu0 %922, %v84_v2  }
  0x5b   :  { %532 = vperm.xlu1 %923, %v87_v3   ;;  %527 = vperm.xlu0 %922, %v86_v1   ;;  %v93_v1 = vld [vmem:[%s1170_s2 + $0x20] sm:$0xff] }
  0x9a   :  { %v178_v30 = vpop.permute.xlu0 %177  ;;  %v168_v31 = vpop.permute.xlu1 %167 }
  0x9b   :  { %v199_v38 = vmul.f32 %v178_v30, %v103_v32  ;;  %v197_v39 = vmul.f32 %v168_v31, %v101_v33  ;;  %v553_v30 = vld [vmem:[#allocation6 + $0x10] sm:$0xff]  ;;  %v552_v31 = vld [vmem:[#allocation6 + $0x8] sm:$0xff]  ;;  %v551_v32 = vld [vmem:[#allocation6] sm:$0xff] }
  0x9c   :  { %884 = vmatprep.subr.mxu1 %v553_v30 }
  0x9d   :  { %885 = vmatpush3.msra.mxu1 %v553_v30 }
  0x9e   :  { %v183_v36 = vpop.permute.xlu0 %182  ;;  %v173_v37 = vpop.permute.xlu1 %172  ;;  %886 = vmatprep.subr.mxu1 %v552_v31 }
  0x9f   :  { %v200_v40 = vmul.f32 %v183_v36, %v104_v34  ;;  %v198_v41 = vmul.f32 %v173_v37, %v102_v35  ;;  %887 = vmatpush3.msra.mxu1 %v552_v31 }
  0xa0   :  { %888 = vmatprep.subr.mxu1 %v551_v32 }
  0xa1   :  { %v240_v44 = vpack.c.bf16 %v200_v40, %v199_v38  ;;  %v239_v47 = vpack.c.bf16 %v198_v41, %v197_v39  ;;  %889 = vmatpush3.msra.mxu1 %v551_v32 }
  0xa2   :  { %v163_v45 = vpop.permute.xlu1 %162  ;;  %v158_v46 = vpop.permute.xlu0 %157 }
  0xa3   :  { %v196_v48 = vmul.f32 %v163_v45, %v100_v42  ;;  %v195_v49 = vmul.f32 %v158_v46, %v99_v43  ;;  %826 = vmatprep.subr.bf16.mxu0 %v240_v44 }
  0xa4   :  { %827 = vmatpush3.bf16.msra.mxu0 %v240_v44 }
  0xa5   :  { %828 = vmatprep.subr.bf16.mxu0 %v239_v47  ;;  %v238_v54 = vpack.c.bf16 %v196_v48, %v195_v49 }
  0xa6   :  { %v153_v52 = vpop.permute.xlu1 %152  ;;  %v148_v53 = vpop.permute.xlu0 %147 }
  0xa7   :  { %v194_v55 = vmul.f32 %v153_v52, %v98_v50  ;;  %v193_v56 = vmul.f32 %v148_v53, %v97_v51 }
  0xa8   :  { %829 = vmatpush3.bf16.msra.mxu0 %v239_v47 }
  0xa9   :  { %830 = vmatprep.subr.bf16.mxu0 %v238_v54  ;;  %v237_v61 = vpack.c.bf16 %v194_v55, %v193_v56 }
  0xaa   :  { %v143_v59 = vpop.permute.xlu1 %142  ;;  %v138_v60 = vpop.permute.xlu0 %137 }
  0xab   :  { %v192_v62 = vmul.f32 %v143_v59, %v96_v57  ;;  %v191_v63 = vmul.f32 %v138_v60, %v95_v58 }
  0xac   :  { %831 = vmatpush3.bf16.msra.mxu0 %v238_v54 }
  0xad   :  { %832 = vmatprep.subr.bf16.mxu0 %v237_v61  ;;  %v236_v4 = vpack.c.bf16 %v192_v62, %v191_v63 }
  0xae   :  { %v133_v2 = vpop.permute.xlu1 %132  ;;  %v128_v3 = vpop.permute.xlu0 %127 }
  0xaf   :  { %v190_v5 = vmul.f32 %v133_v2, %v94_v0  ;;  %v189_v6 = vmul.f32 %v128_v3, %v93_v1 }
  0xb0   :  { %833 = vmatpush3.bf16.msra.mxu0 %v237_v61 }
  0xb1   :  { %834 = vmatprep.subr.bf16.mxu0 %v236_v4  ;;  %v235_v11 = vpack.c.bf16 %v190_v5, %v189_v6 }
  0xb2   :  { %v123_v9 = vpop.permute.xlu1 %122  ;;  %v118_v10 = vpop.permute.xlu0 %117 }
  0xb3   :  { %v188_v12 = vmul.f32 %v123_v9, %v92_v7  ;;  %v187_v13 = vmul.f32 %v118_v10, %v91_v8 }
  0xb4   :  { %835 = vmatpush3.bf16.msra.mxu0 %v236_v4 }
  0xb5   :  { %836 = vmatprep.subr.bf16.mxu0 %v235_v11  ;;  %v234_v18 = vpack.c.bf16 %v188_v12, %v187_v13 }
  0xb6   :  { %v113_v16 = vpop.permute.xlu1 %112  ;;  %v108_v17 = vpop.permute.xlu0 %107 }
  0xb7   :  { %v186_v19 = vmul.f32 %v113_v16, %v90_v14  ;;  %v185_v20 = vmul.f32 %v108_v17, %v89_v15  ;;  %v1144_v17 = vld [vmem:[%s1172_s4] ss:$0 sm:$0xff]  ;;  %s1005_s4 = smov [#allocation8]  }
  0xb8   :  { %837 = vmatpush3.bf16.msra.mxu0 %v235_v11  ;;  %s756_s18 = sshll.u32 %s1005_s4, 4  ;;  %s757_s18 = int_to_ptr.vmem [resolvable:$true] %s756_s18 }
  0xb9   :  { %838 = vmatprep.subr.bf16.mxu0 %v234_v18  ;;  %v233_v21 = vpack.c.bf16 %v186_v19, %v185_v20  ;;  %s972_s19 = scalar_lea.vmem %s757_s18, 2048  ;;  %p977_p11 = scmp.lt.s32.totalorder %s757_s18, %s757_s18 }
  0xba   :  { %v458_v33 = vpop.permute.xlu0 %457  ;;  %v463_v34 = vpop.permute.xlu1 %462  ;;  %p973_p10 = scmp.ne.s32.totalorder %s757_s18, %s972_s19  ;;  %p978_p12 = scmp.lt.s32.totalorder %s972_s19, %s972_s19 }
  0xbc   :  { %839 = vmatpush3.bf16.msra.mxu0 %v234_v18  ;;  %p979_p13 = por %p978_p12, %p977_p11 }
  0xbd   :  { %840 = vmatprep.subr.bf16.mxu0 %v233_v21 }
  0xbe   :  { %v468_v35 = vpop.permute.xlu0 %467  ;;  %v473_v36 = vpop.permute.xlu1 %472  ;;  %p980_p0 = pnand %p979_p13, %p973_p10 }
  0xc0   :  { %841 = vmatpush3.bf16.msra.mxu0 %v233_v21 }
  0xc2   :  { %v478_v38 = vpop.permute.xlu0 %477  ;;  %v483_v41 = vpop.permute.xlu1 %482 }
  0xc3   :  { %843 = vmatmul.mubr.bf16.vlgmr.msra.gmra.mxu0 %v925_v22 }
  0xc4   :  { %846 = vmatprep.mubr.bf16.mxu0 %v926_v23 }
  0xc6   :  { %v488_v44 = vpop.permute.xlu0 %487  ;;  %v493_v48 = vpop.permute.xlu1 %492 }
  0xca   :  { %v498_v53 = vpop.permute.xlu0 %497  ;;  %v503_v56 = vpop.permute.xlu1 %502 }
  0xcb   :  { %847 = vmatmul.mubr.bf16.gmra.mxu0 %v927_v24 }
  0xcc   :  { %850 = vmatprep.mubr.bf16.mxu0 %v928_v25 }
  0xce   :  { %v508_v60 = vpop.permute.xlu0 %507  ;;  %v513_v0 = vpop.permute.xlu1 %512 }
  0xd2   :  { %v518_v5 = vpop.permute.xlu0 %517  ;;  %v523_v9 = vpop.permute.xlu1 %522 }
  0xd3   :  { %851 = vmatmul.mubr.bf16.gmra.mxu0 %v929_v26 }
  0xd4   :  { %854 = vmatprep.mubr.bf16.mxu0 %v930_v27 }
  0xd6   :  { %v528_v12 = vpop.permute.xlu0 %527  ;;  %v533_v15 = vpop.permute.xlu1 %532 }
  0xdb   :  { %855 = vmatmul.mubr.bf16.gmra.mxu0 %v931_v28 }
 0x183   :  { %v844_v37 = vpop.f32.mrf.mxu0 }
 0x184   :  { %v537_v46 = vmul.f32 %v844_v37, %v468_v35 }
 0x185   :  { %v323_v39 = vpop.f32.mrf.mxu0 }
 0x186   :  { %v535_v40 = vmul.f32 %v458_v33, %v323_v39 }
 0x187   :  { %v845_v42 = vpop.f32.mrf.mxu0 }
 0x188   :  { %890 = vmatprep.mubr.f32.mxu1 %v535_v40  ;;  %v538_v50 = vmul.f32 %v845_v42, %v473_v36 }
 0x189   :  { %v326_v43 = vpop.f32.mrf.mxu0 }
 0x18a   :  { %v536_v45 = vmul.f32 %v463_v34, %v326_v43 }
 0x18b   :  { %v848_v47 = vpop.f32.mrf.mxu0 }
 0x18c   :  { %891 = vmatmul.mubr.f32.vlgmr.msra.gmra.mxu1 %v536_v45  ;;  %v541_v57 = vmul.f32 %v848_v47, %v488_v44 }
 0x18d   :  { %v339_v49 = vpop.f32.mrf.mxu0  ;;  %893 = vmatprep.mubr.f32.mxu1 %v537_v46 }
 0x18e   :  { %v539_v51 = vmul.f32 %v478_v38, %v339_v49 }
 0x18f   :  { %v849_v52 = vpop.f32.mrf.mxu0 }
 0x190   :  { %894 = vmatmul.mubr.f32.gmra.mxu1 %v538_v50  ;;  %v542_v61 = vmul.f32 %v849_v52, %v493_v48 }
 0x191   :  { %v342_v54 = vpop.f32.mrf.mxu0  ;;  %896 = vmatprep.mubr.f32.mxu1 %v539_v51 }
 0x192   :  { %v540_v55 = vmul.f32 %v483_v41, %v342_v54 }
 0x193   :  { %v852_v58 = vpop.f32.mrf.mxu0 }
 0x194   :  { %897 = vmatmul.mubr.f32.gmra.mxu1 %v540_v55  ;;  %v545_v3 = vmul.f32 %v852_v58, %v508_v60 }
 0x195   :  { %v355_v59 = vpop.f32.mrf.mxu0  ;;  %899 = vmatprep.mubr.f32.mxu1 %v541_v57 }
 0x196   :  { %v543_v62 = vmul.f32 %v498_v53, %v355_v59 }
 0x197   :  { %v853_v63 = vpop.f32.mrf.mxu0 }
 0x198   :  { %900 = vmatmul.mubr.f32.gmra.mxu1 %v542_v61  ;;  %v546_v7 = vmul.f32 %v853_v63, %v513_v0 }
 0x199   :  { %v358_v1 = vpop.f32.mrf.mxu0  ;;  %902 = vmatprep.mubr.f32.mxu1 %v543_v62 }
 0x19a   :  { %v544_v2 = vmul.f32 %v503_v56, %v358_v1 }
 0x19b   :  { %v856_v4 = vpop.f32.mrf.mxu0 }
 0x19c   :  { %903 = vmatmul.mubr.f32.gmra.mxu1 %v544_v2  ;;  %v549_v14 = vmul.f32 %v856_v4, %v528_v12 }
 0x19d   :  { %v371_v6 = vpop.f32.mrf.mxu0  ;;  %905 = vmatprep.mubr.f32.mxu1 %v545_v3 }
 0x19e   :  { %v547_v8 = vmul.f32 %v518_v5, %v371_v6 }
 0x19f   :  { %v857_v10 = vpop.f32.mrf.mxu0 }
 0x1a0   :  { %906 = vmatmul.mubr.f32.gmra.mxu1 %v546_v7  ;;  %v550_v16 = vmul.f32 %v857_v10, %v533_v15 }
 0x1a1   :  { %v374_v11 = vpop.f32.mrf.mxu0  ;;  %908 = vmatprep.mubr.f32.mxu1 %v547_v8 }
 0x1a2   :  { %v548_v13 = vmul.f32 %v523_v9, %v374_v11 }
 0x1a4   :  { %909 = vmatmul.mubr.f32.gmra.mxu1 %v548_v13 }
 0x1a5   :  { %911 = vmatprep.mubr.f32.mxu1 %v549_v14 }
 0x1a8   :  { %912 = vmatmul.mubr.f32.gmra.mxu1 %v550_v16 }
 0x24c   :  { %v892_v18 = vpop.f32.mrf.mxu1 }
 0x24d   :  { %v646_v19 = vadd.f32 %v892_v18, %v1144_v17 }
 0x24e   :  { %v640_v20 = vpop.f32.mrf.mxu1 }
 0x24f   :  { %v720_v21 = vmax.f32 %v646_v19, 0.0  ;;  %v641_v22 = vadd.f32 %v1144_v17, %v640_v20 }
 0x250   :  { %v895_v23 = vpop.f32.mrf.mxu1 }
 0x251   :  { %736 = vst [vmem:[#allocation8 + $0x8] sm:$0xff] %v720_v21  ;;  %v719_v24 = vmax.f32 %v641_v22, 0.0  ;;  %v656_v25 = vadd.f32 %v895_v23, %v1144_v17 }
 0x252   :  { %v650_v26 = vpop.f32.mrf.mxu1 }
 0x253   :  { %735 = vst [vmem:[#allocation8] sm:$0xff] %v719_v24  ;;  %v722_v27 = vmax.f32 %v656_v25, 0.0  ;;  %v651_v28 = vadd.f32 %v1144_v17, %v650_v26 }
 0x254   :  { %v898_v29 = vpop.f32.mrf.mxu1 }
 0x255   :  { %738 = vst [vmem:[#allocation8 + $0x18] sm:$0xff] %v722_v27  ;;  %v721_v30 = vmax.f32 %v651_v28, 0.0  ;;  %v666_v31 = vadd.f32 %v898_v29, %v1144_v17 }
 0x256   :  { %v660_v32 = vpop.f32.mrf.mxu1 }
 0x257   :  { %737 = vst [vmem:[#allocation8 + $0x10] sm:$0xff] %v721_v30  ;;  %v724_v33 = vmax.f32 %v666_v31, 0.0  ;;  %v661_v34 = vadd.f32 %v1144_v17, %v660_v32 }
 0x258   :  { %v901_v35 = vpop.f32.mrf.mxu1 }
 0x259   :  { %740 = vst [vmem:[#allocation8 + $0x28] sm:$0xff] %v724_v33  ;;  %v723_v36 = vmax.f32 %v661_v34, 0.0  ;;  %v676_v37 = vadd.f32 %v901_v35, %v1144_v17 }
 0x25a   :  { %v670_v38 = vpop.f32.mrf.mxu1 }
 0x25b   :  { %739 = vst [vmem:[#allocation8 + $0x20] sm:$0xff] %v723_v36  ;;  %v726_v39 = vmax.f32 %v676_v37, 0.0  ;;  %v671_v40 = vadd.f32 %v1144_v17, %v670_v38 }
 0x25c   :  { %v904_v41 = vpop.f32.mrf.mxu1 }
 0x25d   :  { %742 = vst [vmem:[#allocation8 + $0x38] sm:$0xff] %v726_v39  ;;  %v725_v42 = vmax.f32 %v671_v40, 0.0  ;;  %v686_v43 = vadd.f32 %v904_v41, %v1144_v17 }
 0x25e   :  { %v680_v44 = vpop.f32.mrf.mxu1 }
 0x25f   :  { %741 = vst [vmem:[#allocation8 + $0x30] sm:$0xff] %v725_v42  ;;  %v728_v45 = vmax.f32 %v686_v43, 0.0  ;;  %v681_v46 = vadd.f32 %v1144_v17, %v680_v44 }
 0x260   :  { %v907_v47 = vpop.f32.mrf.mxu1 }
 0x261   :  { %744 = vst [vmem:[#allocation8 + $0x48] sm:$0xff] %v728_v45  ;;  %v727_v48 = vmax.f32 %v681_v46, 0.0  ;;  %v696_v49 = vadd.f32 %v907_v47, %v1144_v17 }
 0x262   :  { %v690_v50 = vpop.f32.mrf.mxu1 }
 0x263   :  { %743 = vst [vmem:[#allocation8 + $0x40] sm:$0xff] %v727_v48  ;;  %v730_v51 = vmax.f32 %v696_v49, 0.0  ;;  %v691_v52 = vadd.f32 %v1144_v17, %v690_v50 }
 0x264   :  { %v910_v53 = vpop.f32.mrf.mxu1 }
 0x265   :  { %746 = vst [vmem:[#allocation8 + $0x58] sm:$0xff] %v730_v51  ;;  %v729_v54 = vmax.f32 %v691_v52, 0.0  ;;  %v706_v55 = vadd.f32 %v910_v53, %v1144_v17 }
 0x266   :  { %v700_v56 = vpop.f32.mrf.mxu1 }
 0x267   :  { %745 = vst [vmem:[#allocation8 + $0x50] sm:$0xff] %v729_v54  ;;  %v732_v57 = vmax.f32 %v706_v55, 0.0  ;;  %v701_v58 = vadd.f32 %v1144_v17, %v700_v56 }
 0x268   :  { %v913_v59 = vpop.f32.mrf.mxu1 }
 0x269   :  { %748 = vst [vmem:[#allocation8 + $0x68] sm:$0xff] %v732_v57  ;;  %v731_v60 = vmax.f32 %v701_v58, 0.0  ;;  %v716_v61 = vadd.f32 %v913_v59, %v1144_v17 }
 0x26a   :  { %v710_v62 = vpop.f32.mrf.mxu1 }
 0x26b   :  { %747 = vst [vmem:[#allocation8 + $0x60] sm:$0xff] %v731_v60  ;;  %v734_v63 = vmax.f32 %v716_v61, 0.0  ;;  %v711_v0 = vadd.f32 %v1144_v17, %v710_v62 }
 0x26d   :  { %750 = vst [vmem:[#allocation8 + $0x78] sm:$0xff] %v734_v63  ;;  %v733_v1 = vmax.f32 %v711_v0, 0.0 }
 0x26f   :  { %749 = vst [vmem:[#allocation8 + $0x70] sm:$0xff] %v733_v1 }
 0x270   :  { %983 = shalt.err (!%p980_p0)
}
 0x271   :  { %762 = dma.vmem_to_hbm [thread:$0]  %s757_s18, 2048, %s1173_s5, [#allocation5], %s1002_s28, %s1002_s28, %s1003_s29  }
 0x272   :  { %996 = dma.done.wait [#allocation5], 2048  }
 0x273   :  { %997 = vsyncadd [#allocation5], 4294965248 }
 0x274   :  { %766 = vsyncpa [#allocation4], 1 }
 0x275   :  { %767 = vsyncpa [#allocation7], 1 }
 0x276   :  { %768 = vsyncpa [#allocation5], 1 }

</bundles_post_ra>
